<compile_context>
chip_gen: v6e
topology: v6e:2x2x1
jax: 0.10.0
libtpu: 0.0.40
codegen_flags: <defaults>
</compile_context>

<pallas_src>
import functools
import math

import numpy as np

import jax
import jax.numpy as jnp
from jax.experimental import pallas as pl
from jax.experimental.pallas import tpu as pltpu


# -----------------------------------------------------------------------------
# Pallas kernel: accumulate (+refractory) -> fire -> reset -> leak, elementwise.
# Input refs (in order): u, v_th, [v], [ref_cnt]; outputs: spike, v_out.
# All math is f32 in-kernel regardless of the streamed I/O dtype.
# -----------------------------------------------------------------------------
def _lif_kernel(*refs, reset_mode, v_reset, dv, alpha, beta, adpt_en,
                has_v, has_ref, v_init):
    it = iter(refs)
    u_ref = next(it)
    vth_ref = next(it)
    v_ref = next(it) if has_v else None
    ref_ref = next(it) if has_ref else None
    spike_ref = next(it)
    vout_ref = next(it)

    f32 = jnp.float32
    u = u_ref[...].astype(f32)
    v_th = vth_ref[...].astype(f32)   # compact (row_blk, lanes) broadcasts over batch

    # ---- 1. accumulate with refractory mask ---------------------------------
    if has_v:
        v_prev = v_ref[...].astype(f32)
    else:
        v_prev = jnp.asarray(0.0 if v_init is None else v_init, f32)
    if has_ref:
        # integer (any width) compare, no casts
        v = jnp.where(ref_ref[...] <= 0, v_prev + u, v_prev)
    else:
        v = v_prev + u

    # ---- 2. fire (Heaviside forward of the Rectangle surrogate) -------------
    spike_mask = v >= v_th

    # ---- 3. reset (static reset mode, resolved at trace time) ---------------
    if reset_mode == "hard":
        v = jnp.where(spike_mask, jnp.asarray(v_reset, f32), v)
    elif reset_mode == "soft":
        v = jnp.where(spike_mask, v - v_th, v)
    elif reset_mode == "soft_constant":
        v = jnp.where(spike_mask, v - jnp.asarray(dv, f32), v)
    else:
        raise ValueError(f"unknown reset_mode {reset_mode!r}")

    # ---- 4. leaky ------------------------------------------------------------
    if adpt_en:
        v = alpha * v + beta * (1.0 - spike_mask.astype(f32))
    else:
        v = alpha * v + beta

    spike_ref[...] = spike_mask.astype(spike_ref.dtype)
    vout_ref[...] = v.astype(vout_ref.dtype)


# -----------------------------------------------------------------------------
# Tiling selection: lane-dense layout, ~4 MiB blocks, >= 4 grid steps when the
# data is large enough (>= 2 steps per v7x TensorCore for DMA overlap).
# -----------------------------------------------------------------------------
def _choose_tiling(B, N, *, dtype_bytes, sub,
                   max_block_bytes=4 * 1024 * 1024,
                   min_block_bytes=512 * 1024,
                   target_steps=4):
    # Lane width: largest multiple of 128 dividing N, preferring a row count
    # that is a multiple of the sublane requirement `sub` (8/16/32 per dtype).
    lanes = None
    for cand in (2048, 1024, 512, 256, 128):
        if N % cand == 0 and (N // cand) % sub == 0:
            lanes = cand
            break
    if lanes is None:
        for cand in (2048, 1024, 512, 256, 128):
            if N % cand == 0:
                lanes = cand
                break
    if lanes is None:
        raise ValueError(
            f"per-sample neuron count ({N}) must be a multiple of 128 for the "
            "lane-dense TPU layout")
    rows = N // lanes

    row_bytes = lanes * dtype_bytes
    max_rows = max(1, max_block_bytes // row_bytes)

    if rows <= max_rows:
        row_blk = rows                       # full row dim (always legal)
    else:
        # Largest multiple of `sub` dividing rows that fits the block budget.
        row_blk = None
        r = (max_rows // sub) * sub
        while r >= sub:
            if rows % r == 0:
                row_blk = r
                break
            r -= sub
        if row_blk is None:
            # Cap: sub-aligned block + partial last block via cdiv (elementwise,
            # padding is discarded) instead of blowing past max_block_bytes.
            row_blk = min(rows, max(sub, (max_rows // sub) * sub))

    # Fold whole samples into one block when a per-sample slab is small.
    b_blk = 1
    if row_blk == rows:
        per_sample_bytes = rows * lanes * dtype_bytes
        b_blk = min(B, max(1, max_block_bytes // per_sample_bytes))
        while b_blk > 1 and B % b_blk:
            b_blk -= 1

    # Aim for >= target_steps total grid steps (>= 2 per v7x TensorCore) so the
    # DMA pipeline overlaps, but never shrink a block below min_block_bytes.
    def _steps(rb, bb):
        return (-(-rows // rb)) * (B // bb)

    def _bytes(rb, bb):
        return bb * rb * lanes * dtype_bytes

    while _steps(row_blk, b_blk) < target_steps:
        changed = False
        if b_blk > 1 and _bytes(row_blk, b_blk) // 2 >= min_block_bytes:
            nb = b_blk // 2
            while nb > 1 and B % nb:
                nb -= 1
            nb = max(1, nb)
            if nb < b_blk:
                b_blk = nb
                changed = True
        if not changed and row_blk > sub and \
                _bytes(row_blk, b_blk) // 2 >= min_block_bytes:
            half = max(sub, ((row_blk // 2) // sub) * sub)
            cand = None
            r = half
            while r >= sub:
                if rows % r == 0:
                    cand = r
                    break
                r -= sub
            new_rb = cand if cand is not None else half
            if new_rb < row_blk:
                row_blk = new_rb
                changed = True
        if not changed:
            break

    return lanes, rows, row_blk, b_blk


# -----------------------------------------------------------------------------
# Python wrapper.
# -----------------------------------------------------------------------------
def lif_forward(u_in, v_th, v=None, ref_cnt=None, *,
                v_leaky_alpha, v_leaky_beta, reset_mode,
                v_reset=None, dv=None, v_leaky_adpt_en=False, v_init=None,
                spike_dtype=None, alias_v_state=False):
    # Validate the static config early (clear errors instead of trace-time ones).
    if reset_mode not in ("hard", "soft", "soft_constant"):
        raise ValueError(f"unknown reset_mode {reset_mode!r}")
    if reset_mode == "hard" and v_reset is None:
        raise ValueError("reset_mode='hard' requires v_reset")
    if reset_mode == "soft_constant" and dv is None:
        raise ValueError("reset_mode='soft_constant' requires dv")

    orig_shape = u_in.shape
    dtype = u_in.dtype
    # int8 spikes by default: 4x less HBM traffic on the spike stream; values
    # are still exactly 0/1.  Pass spike_dtype=u_in.dtype for torch parity.
    spike_dtype = jnp.int8 if spike_dtype is None else spike_dtype
    B = orig_shape[0]
    N = math.prod(orig_shape[1:])

    has_v = v is not None
    has_ref = ref_cnt is not None

    # Sublane-multiple requirement across every streamed dtype (f32->8,
    # bf16/fp16->16, int8/bool->32).  A block whose row dim equals the full
    # row dim is always legal, regardless.
    stream_dtypes = [dtype, dtype]                      # u, v_th
    if has_v:
        stream_dtypes.append(dtype)
    if has_ref:
        stream_dtypes.append(ref_cnt.dtype)
    stream_dtypes += [spike_dtype, dtype]               # outputs
    sub = max(max(1, 32 // np.dtype(d).itemsize) for d in stream_dtypes)
    dtype_bytes = np.dtype(dtype).itemsize

    lanes, rows, row_blk, b_blk = _choose_tiling(
        B, N, dtype_bytes=dtype_bytes, sub=sub)
    row_steps = pl.cdiv(rows, row_blk)
    batch_steps = B // b_blk
    # Batch axis is the INNERMOST (fastest-varying) grid axis so the compact
    # v_th block index stays constant across consecutive steps (no re-DMA).
    grid = (row_steps, batch_steps)

    full_blk_shape = (b_blk, row_blk, lanes)
    full_blk = pl.BlockSpec(full_blk_shape, lambda i, b: (b, i, 0))
    vth_blk = pl.BlockSpec((row_blk, lanes), lambda i, b: (i, 0))  # batch-invariant

    def to_full(x):
        return x.reshape(B, rows, lanes)

    full_blk_elems = b_blk * row_blk * lanes
    pipeline_bytes = 0

    def _count(elems, d):
        nonlocal pipeline_bytes
        pipeline_bytes += 2 * elems * np.dtype(d).itemsize   # double-buffered

    # ---- assemble input streams (skip the ones that are all-default) --------
    inputs = [to_full(u_in)]
    in_specs = [full_blk]
    _count(full_blk_elems, dtype)

    has_full_vth = (B > 1) and (v_th.size == u_in.size)
    if has_full_vth:
        # Per-sample thresholds were given explicitly: stream them like u.
        inputs.append(to_full(v_th.astype(dtype)))
        in_specs.append(full_blk)
        _count(full_blk_elems, dtype)
    else:
        # Compact per-neuron thresholds: no batch broadcast in HBM; the same
        # v_th block stays resident across the (innermost) batch grid steps.
        vth_c = jnp.broadcast_to(v_th.astype(dtype), (1,) + tuple(orig_shape[1:]))
        inputs.append(vth_c.reshape(rows, lanes))
        in_specs.append(vth_blk)
        _count(row_blk * lanes, dtype)

    v_input_index = None
    if has_v:
        v_input_index = len(inputs)
        inputs.append(to_full(v.astype(dtype)))
        in_specs.append(full_blk)
        _count(full_blk_elems, dtype)

    if has_ref:
        inputs.append(to_full(ref_cnt))      # consumed in its own (narrow) dtype
        in_specs.append(full_blk)
        _count(full_blk_elems, ref_cnt.dtype)

    _count(full_blk_elems, spike_dtype)      # spike output
    _count(full_blk_elems, dtype)            # v_out output

    # Explicit scoped-VMEM limit: actual double-buffered footprint + headroom,
    # capped at 56 MiB (safe on v7x 64 MiB/TC; lifts v5e's 16 MiB default).
    vmem_limit = int(min(max(pipeline_bytes + (8 << 20), 32 << 20), 56 << 20))

    kernel = functools.partial(
        _lif_kernel,
        reset_mode=reset_mode, v_reset=v_reset, dv=dv,
        alpha=v_leaky_alpha, beta=v_leaky_beta, adpt_en=v_leaky_adpt_en,
        has_v=has_v, has_ref=has_ref, v_init=v_init)

    io_aliases = {}
    if alias_v_state and has_v and dtype == jnp.dtype(dtype):
        # Alias the membrane-state input onto the v_out output (caller should
        # donate `v` for true in-place reuse inside an SNN timestep loop).
        io_aliases = {v_input_index: 1}

    spike2, vout2 = pl.pallas_call(
        kernel,
        out_shape=(jax.ShapeDtypeStruct((B, rows, lanes), spike_dtype),
                   jax.ShapeDtypeStruct((B, rows, lanes), dtype)),
        grid_spec=pltpu.PrefetchScalarGridSpec(
            num_scalar_prefetch=0,
            grid=grid,
            in_specs=in_specs,
            out_specs=[full_blk, full_blk]),
        compiler_params=pltpu.CompilerParams(
            dimension_semantics=("parallel", "parallel"),
            vmem_limit_bytes=vmem_limit),
        input_output_aliases=io_aliases,
    )(*inputs)

    return spike2.reshape(orig_shape), vout2.reshape(orig_shape)


# -----------------------------------------------------------------------------
# Pure-JAX reference for correctness checks.
# -----------------------------------------------------------------------------
def lif_ref(u_in, v_th, v, ref_cnt, *, alpha, beta, reset_mode,
            v_reset=None, dv=None, adpt_en=False):
    active = (ref_cnt <= 0).astype(u_in.dtype)
    v = v + u_in * active
    spike = (v >= v_th).astype(u_in.dtype)
    if reset_mode == "hard":
        v = jnp.where(spike > 0, v_reset, v)
    elif reset_mode == "soft":
        v = v - spike * v_th
    else:
        v = v - spike * dv
    if adpt_en:
        v = alpha * v + beta * (1.0 - spike)
    else:
        v = alpha * v + beta
    return spike, v


if __name__ == "__main__":
    key = jax.random.PRNGKey(0)
    k1, k2, k3, k4 = jax.random.split(key, 4)

    B, C, H, W = 2, 4, 16, 16          # NCHW
    u_in = jax.random.normal(k1, (B, C, H, W), dtype=jnp.float32)
    # per-neuron (per C,H,W) threshold, shared over batch
    v_th = 0.5 + 0.1 * jax.random.uniform(k2, (1, C, H, W), dtype=jnp.float32)
    v_prev = 0.3 * jax.random.normal(k3, (B, C, H, W), dtype=jnp.float32)
    ref_cnt = (jax.random.uniform(k4, (B, C, H, W)) < 0.25).astype(jnp.int32) * 2

    cfg = dict(v_leaky_alpha=0.9, v_leaky_beta=0.05,
               reset_mode="hard", v_reset=0.0, dv=0.2,
               v_leaky_adpt_en=False, v_init=0.0)
    vth_full = jnp.broadcast_to(v_th, u_in.shape)
    f32 = jnp.float32

    # --- full-state call (v and ref_cnt provided) ----------------------------
    spike, v_out = lif_forward(u_in, v_th, v_prev, ref_cnt, **cfg)
    spike, v_out = jax.block_until_ready((spike, v_out))
    spike_r, v_r = lif_ref(u_in, vth_full, v_prev, ref_cnt,
                           alpha=0.9, beta=0.05, reset_mode="hard",
                           v_reset=0.0, dv=0.2)
    assert spike.shape == (B, C, H, W) and v_out.shape == (B, C, H, W)
    assert spike.dtype == jnp.int8
    assert jnp.allclose(spike.astype(f32), spike_r), "spike mismatch (full state)"
    assert jnp.allclose(v_out, v_r, atol=1e-6), "membrane mismatch (full state)"

    # --- default-state call (v=None, ref_cnt=None -> streams omitted) --------
    spike0, v_out0 = lif_forward(u_in, v_th, **cfg)
    spike0, v_out0 = jax.block_until_ready((spike0, v_out0))
    spike0_r, v0_r = lif_ref(u_in, vth_full, jnp.zeros_like(u_in),
                             jnp.zeros(u_in.shape, jnp.int32),
                             alpha=0.9, beta=0.05, reset_mode="hard",
                             v_reset=0.0, dv=0.2)
    assert jnp.allclose(spike0.astype(f32), spike0_r), "spike mismatch (default state)"
    assert jnp.allclose(v_out0, v0_r, atol=1e-6), "membrane mismatch (default state)"

    # --- soft reset mode, torch-parity spike dtype ----------------------------
    spike_s, v_s = lif_forward(u_in, v_th, v_prev, ref_cnt,
                               v_leaky_alpha=0.9, v_leaky_beta=0.05,
                               reset_mode="soft", v_leaky_adpt_en=False,
                               spike_dtype=u_in.dtype)
    spike_s, v_s = jax.block_until_ready((spike_s, v_s))
    spike_sr, v_sr = lif_ref(u_in, vth_full, v_prev, ref_cnt,
                             alpha=0.9, beta=0.05, reset_mode="soft")
    assert spike_s.dtype == u_in.dtype
    assert jnp.allclose(spike_s, spike_sr), "spike mismatch (soft reset)"
    assert jnp.allclose(v_s, v_sr, atol=1e-6), "membrane mismatch (soft reset)"

    # --- bf16 I/O path + narrow int8 ref_cnt + adaptive leak ------------------
    u_bf = u_in.astype(jnp.bfloat16)
    v_bf = v_prev.astype(jnp.bfloat16)
    vth_bf = v_th.astype(jnp.bfloat16)
    ref8 = ref_cnt.astype(jnp.int8)
    spike_b, v_b = lif_forward(u_bf, vth_bf, v_bf, ref8,
                               v_leaky_alpha=0.9, v_leaky_beta=0.05,
                               reset_mode="soft_constant", dv=0.2,
                               v_leaky_adpt_en=True)
    spike_b, v_b = jax.block_until_ready((spike_b, v_b))
    spike_br, v_br = lif_ref(u_bf.astype(f32),
                             jnp.broadcast_to(vth_bf, u_in.shape).astype(f32),
                             v_bf.astype(f32), ref8,
                             alpha=0.9, beta=0.05, reset_mode="soft_constant",
                             dv=0.2, adpt_en=True)
    assert jnp.allclose(spike_b.astype(f32), spike_br), "spike mismatch (bf16)"
    assert jnp.allclose(v_b.astype(f32),
                        v_br.astype(jnp.bfloat16).astype(f32),
                        atol=2e-2), "membrane mismatch (bf16)"

    print("KERNEL_OK")
</pallas_src>

<mosaic_0001>
module attributes {stable_mosaic.version = 11 : i64} {
  func.func @_lif_kernel(%arg0: i32, %arg1: i32, %arg2: memref<2x1x1024xf32, #tpu.memory_space<vmem>>, %arg3: memref<1x1024xf32, #tpu.memory_space<vmem>>, %arg4: memref<2x1x1024xf32, #tpu.memory_space<vmem>>, %arg5: memref<2x1x1024xi32, #tpu.memory_space<vmem>>, %arg6: memref<2x1x1024xi8, #tpu.memory_space<vmem>>, %arg7: memref<2x1x1024xf32, #tpu.memory_space<vmem>>) attributes {dimension_semantics = [#tpu.dimension_semantics<parallel>, #tpu.dimension_semantics<parallel>], iteration_bounds = array<i64: 1, 1>, scalar_prefetch = 0 : i64, scratch_operands = 0 : i64, tpu.core_type = #tpu.core_type<tc>, window_params = [{transform_indices = @transform_0, window_bounds = array<i64: 2, 1, 1024>}, {transform_indices = @transform_1, window_bounds = array<i64: 1, 1024>}, {transform_indices = @transform_2, window_bounds = array<i64: 2, 1, 1024>}, {transform_indices = @transform_3, window_bounds = array<i64: 2, 1, 1024>}, {transform_indices = @transform_4, window_bounds = array<i64: 2, 1, 1024>}, {transform_indices = @transform_5, window_bounds = array<i64: 2, 1, 1024>}]} {
    %c0 = arith.constant 0 : index
    %c0_0 = arith.constant 0 : index
    %c0_1 = arith.constant 0 : index
    %0 = vector.load %arg2[%c0, %c0_0, %c0_1] : memref<2x1x1024xf32, #tpu.memory_space<vmem>>, vector<2x1x1024xf32>
    %c0_2 = arith.constant 0 : index
    %c0_3 = arith.constant 0 : index
    %1 = vector.load %arg3[%c0_2, %c0_3] : memref<1x1024xf32, #tpu.memory_space<vmem>>, vector<1x1024xf32>
    %c0_4 = arith.constant 0 : index
    %c0_5 = arith.constant 0 : index
    %c0_6 = arith.constant 0 : index
    %2 = vector.load %arg4[%c0_4, %c0_5, %c0_6] : memref<2x1x1024xf32, #tpu.memory_space<vmem>>, vector<2x1x1024xf32>
    %c0_7 = arith.constant 0 : index
    %c0_8 = arith.constant 0 : index
    %c0_9 = arith.constant 0 : index
    %3 = vector.load %arg5[%c0_7, %c0_8, %c0_9] : memref<2x1x1024xi32, #tpu.memory_space<vmem>>, vector<2x1x1024xi32>
    %c0_i32 = arith.constant 0 : i32
    %4 = vector.broadcast %c0_i32 : i32 to vector<2x1x1024xi32>
    %5 = arith.cmpi sle, %3, %4 : vector<2x1x1024xi32>
    %6 = arith.addf %2, %0 : vector<2x1x1024xf32>
    %7 = arith.select %5, %6, %2 : vector<2x1x1024xi1>, vector<2x1x1024xf32>
    %8 = vector.shape_cast %1 : vector<1x1024xf32> to vector<1x1x1024xf32>
    %9 = vector.broadcast %8 : vector<1x1x1024xf32> to vector<2x1x1024xf32>
    %10 = arith.cmpf oge, %7, %9 : vector<2x1x1024xf32>
    %cst = arith.constant 0.000000e+00 : f32
    %11 = vector.broadcast %cst : f32 to vector<2x1x1024xf32>
    %12 = arith.select %10, %11, %7 : vector<2x1x1024xi1>, vector<2x1x1024xf32>
    %cst_10 = arith.constant 0.899999976 : f32
    %13 = vector.broadcast %cst_10 : f32 to vector<2x1x1024xf32>
    %14 = arith.mulf %13, %12 : vector<2x1x1024xf32>
    %cst_11 = arith.constant 5.000000e-02 : f32
    %15 = vector.broadcast %cst_11 : f32 to vector<2x1x1024xf32>
    %16 = arith.addf %14, %15 : vector<2x1x1024xf32>
    %17 = arith.extui %10 : vector<2x1x1024xi1> to vector<2x1x1024xi8>
    %c0_12 = arith.constant 0 : index
    %c0_13 = arith.constant 0 : index
    %c0_14 = arith.constant 0 : index
    %18 = vector.load %arg6[%c0_12, %c0_13, %c0_14] : memref<2x1x1024xi8, #tpu.memory_space<vmem>>, vector<2x1x1024xi8>
    tpu.vector_store %arg6[%c0_12, %c0_13, %c0_14], %17 {strides = array<i32>} : memref<2x1x1024xi8, #tpu.memory_space<vmem>>, vector<2x1x1024xi8>,
    %c0_15 = arith.constant 0 : index
    %c0_16 = arith.constant 0 : index
    %c0_17 = arith.constant 0 : index
    %19 = vector.load %arg7[%c0_15, %c0_16, %c0_17] : memref<2x1x1024xf32, #tpu.memory_space<vmem>>, vector<2x1x1024xf32>
    tpu.vector_store %arg7[%c0_15, %c0_16, %c0_17], %16 {strides = array<i32>} : memref<2x1x1024xf32, #tpu.memory_space<vmem>>, vector<2x1x1024xf32>,
    return
  }
  func.func @transform_0(%arg0: i32, %arg1: i32) -> (i32, i32, i32) {
    %c0_i32 = arith.constant 0 : i32
    %c0_i32_0 = arith.constant 0 : i32
    return %arg1, %arg0, %c0_i32 : i32, i32, i32
  }
  func.func @transform_1(%arg0: i32, %arg1: i32) -> (i32, i32) {
    %c0_i32 = arith.constant 0 : i32
    %c0_i32_0 = arith.constant 0 : i32
    return %arg0, %c0_i32 : i32, i32
  }
  func.func @transform_2(%arg0: i32, %arg1: i32) -> (i32, i32, i32) {
    %c0_i32 = arith.constant 0 : i32
    %c0_i32_0 = arith.constant 0 : i32
    return %arg1, %arg0, %c0_i32 : i32, i32, i32
  }
  func.func @transform_3(%arg0: i32, %arg1: i32) -> (i32, i32, i32) {
    %c0_i32 = arith.constant 0 : i32
    %c0_i32_0 = arith.constant 0 : i32
    return %arg1, %arg0, %c0_i32 : i32, i32, i32
  }
  func.func @transform_4(%arg0: i32, %arg1: i32) -> (i32, i32, i32) {
    %c0_i32 = arith.constant 0 : i32
    %c0_i32_0 = arith.constant 0 : i32
    return %arg1, %arg0, %c0_i32 : i32, i32, i32
  }
  func.func @transform_5(%arg0: i32, %arg1: i32) -> (i32, i32, i32) {
    %c0_i32 = arith.constant 0 : i32
    %c0_i32_0 = arith.constant 0 : i32
    return %arg1, %arg0, %c0_i32 : i32, i32, i32
  }
}

</mosaic_0001>

<bundles_post_ra>
// kernel: tpu_custom_call.1
= control target key start
LH: loop header
LB: loop body
LE: loop exit
PB: predicated region body
PF: predicated region fallthrough
CT: control target
= control target key end

     0   :  { %11 = vsyncpa [#allocation3], 0  ;;  %s818_s0 = inlined_call_operand.hbm [shape: f32[2,1,1024], index: 0, kind: input, shape index: {}]   ;;  %s819_s1 = inlined_call_operand.hbm [shape: f32[1,1024], index: 1, kind: input, shape index: {}]   ;;  %s820_s2 = inlined_call_operand.hbm [shape: f32[2,1,1024], index: 2, kind: input, shape index: {}]   ;;  %s821_s3 = inlined_call_operand.hbm [shape: s32[2,1,1024], index: 3, kind: input, shape index: {}]   ;;  %s822_s4 = inlined_call_operand.vmem [shape: s8[2,1,1024], index: 4, kind: output, shape index: {0}]   ;;  %s823_s5 = inlined_call_operand.hbm [shape: f32[2,1,1024], index: 5, kind: output, shape index: {1}]  }
   0x1   :  { %12 = vsyncpa [#allocation6], 0 }
   0x2   :  { %13 = vsyncpa [#allocation9], 0 }
   0x3   :  { %14 = vsyncpa [#allocation4], 0  ;;  %s591_s18 = smov [#allocation5]   ;;  %s592_s20 = smov [#allocation2]  }
   0x4   :  { %s33_s19 = sshll.u32 %s591_s18, 4  ;;  %s20_s21 = sshll.u32 %s592_s20, 4  ;;  %s34_s19 = int_to_ptr.vmem [resolvable:$true] %s33_s19  ;;  %s21_s21 = int_to_ptr.vmem [resolvable:$true] %s20_s21 }
   0x5   :  { %s491_s22 = scalar_lea.vmem %s34_s19, 128  ;;  %p496_p1 = scmp.lt.s32.totalorder %s34_s19, %s34_s19 }
   0x6   :  { %p492_p0 = scmp.ne.s32.totalorder %s34_s19, %s491_s22  ;;  %p497_p2 = scmp.lt.s32.totalorder %s491_s22, %s491_s22 }
   0x8   :  { %p498_p3 = por %p497_p2, %p496_p1 }
   0xa   :  { %p499_p4 = pnand %p498_p3, %p492_p0 }
   0xc   :  { %502 = shalt.err (!%p499_p4)
}
   0xd   :  { %36 = dma.hbm_to_vmem [thread:$0]  %s819_s1, 128, %s34_s19, [#allocation6]  }
   0xe   :  { %s511_s25 = scalar_lea.vmem %s21_s21, 256  ;;  %p516_p6 = scmp.lt.s32.totalorder %s21_s21, %s21_s21 }
   0xf   :  { %p512_p5 = scmp.ne.s32.totalorder %s21_s21, %s511_s25  ;;  %p517_p7 = scmp.lt.s32.totalorder %s511_s25, %s511_s25 }
  0x11   :  { %p518_p8 = por %p517_p7, %p516_p6 }
  0x13   :  { %p519_p9 = pnand %p518_p8, %p512_p5 }
  0x15   :  { %522 = shalt.err (!%p519_p9)
}
  0x16   :  { %s593_s26 = smov 128   ;;  %s594_s27 = smov 8  }
  0x17   :  { %26 = dma.hbm_to_vmem [thread:$0]  %s818_s0, 256, %s21_s21, [#allocation3], %s593_s26, %s593_s26, %s594_s27  }
  0x18   :  { %s595_s30 = smov [#allocation7]   ;;  %s596_s7 = smov [#allocation8]  }
  0x19   :  { %s42_s6 = sshll.u32 %s595_s30, 4  ;;  %s54_s1 = sshll.u32 %s596_s7, 4  ;;  %s43_s6 = int_to_ptr.vmem [resolvable:$true] %s42_s6  ;;  %s55_s1 = int_to_ptr.vmem [resolvable:$true] %s54_s1 }
  0x1a   :  { %s531_s8 = scalar_lea.vmem %s43_s6, 256  ;;  %p536_p11 = scmp.lt.s32.totalorder %s43_s6, %s43_s6 }
  0x1b   :  { %p532_p10 = scmp.ne.s32.totalorder %s43_s6, %s531_s8  ;;  %p537_p12 = scmp.lt.s32.totalorder %s531_s8, %s531_s8 }
  0x1d   :  { %p538_p13 = por %p537_p12, %p536_p11 }
  0x1f   :  { %p539_p0 = pnand %p538_p13, %p532_p10 }
  0x21   :  { %542 = shalt.err (!%p539_p0)
}
  0x22   :  { %48 = dma.hbm_to_vmem [thread:$0]  %s820_s2, 256, %s43_s6, [#allocation6], %s593_s26, %s593_s26, %s594_s27  }
  0x23   :  { %s551_s0 = scalar_lea.vmem %s55_s1, 256  ;;  %p556_p2 = scmp.lt.s32.totalorder %s55_s1, %s55_s1 }
  0x24   :  { %p552_p1 = scmp.ne.s32.totalorder %s55_s1, %s551_s0  ;;  %p557_p3 = scmp.lt.s32.totalorder %s551_s0, %s551_s0 }
  0x26   :  { %p558_p4 = por %p557_p3, %p556_p2 }
  0x28   :  { %p559_p5 = pnand %p558_p4, %p552_p1 }
  0x2a   :  { %562 = shalt.err (!%p559_p5)
}
  0x2b   :  { %60 = dma.hbm_to_vmem [thread:$0]  %s821_s3, 256, %s55_s1, [#allocation9], %s593_s26, %s593_s26, %s594_s27  }
  0x2c   :  { %583 = dma.done.wait [#allocation3], 256  }
  0x2d   :  { %584 = vsyncadd [#allocation3], 4294967040 }
  0x2e   :  { %585 = dma.done.wait [#allocation6], 384  }
  0x2f   :  { %586 = vsyncadd [#allocation6], 4294966912 }
  0x30   :  { %587 = dma.done.wait [#allocation9], 256  }
  0x31   :  { %588 = vsyncadd [#allocation9], 4294967040  ;;  %v101_v0 = vlaneseq  ;;  %v597_v1 = vmov 286326784   ;;  %v598_v3 = vmov 858989090   ;;  %v75_v16 = vld [vmem:[#allocation2] sm:$0xff] }
  0x32   :  { %v99_v2 = vunpack.c.l.s4 %v597_v1  ;;  %v106_v4 = vunpack.c.l.s4 %v598_v3  ;;  %v599_v5 = vmov 1431651396   ;;  %v600_v7 = vmov 2004313702   ;;  %v77_v17 = vld [vmem:[#allocation5] sm:$0xff]  ;;  %v78_v18 = vld [vmem:[#allocation7] sm:$0xff] }
  0x33   :  { %v113_v6 = vunpack.c.l.s4 %v599_v5  ;;  %v120_v8 = vunpack.c.l.s4 %v600_v7  ;;  %v102_v10 = vshrl.u32 %v101_v0, 7  ;;  %v601_v14 = vmov 1966171168   ;;  %v80_v19 = vld [vmem:[#allocation8] sm:$0xff]  ;;  %v79_v23 = vld [vmem:[#allocation7 + $0x8] sm:$0xff]  ;;  %v81_v26 = vld [vmem:[#allocation8 + $0x8] sm:$0xff] }
  0x34   :  { %v100_v9 = vunpack.c.0.s8 %v99_v2  ;;  %v107_v11 = vunpack.c.0.s8 %v106_v4  ;;  %v182_v15 = vunpack.c.l.s4 %v601_v14  ;;  %vm408_vm0 = vcmask 1040384   ;;  %v76_v22 = vld [vmem:[#allocation2 + $0x8] sm:$0xff]  ;;  %s603_s2 = smov [#allocation10]  }
  0x35   :  { %v114_v12 = vunpack.c.0.s8 %v113_v6  ;;  %v121_v13 = vunpack.c.0.s8 %v120_v8  ;;  %v84_v20 = vadd.f32 %v78_v18, %v75_v16  ;;  %vm409_vm1 = vsmask.f32 0  ;;  %s454_s3 = sshll.u32 %s603_s2, 4  ;;  %s455_s3 = int_to_ptr.vmem [resolvable:$true] %s454_s3 }
  0x36   :  { %v103_v21 = vsub.s32 %v100_v9, %v102_v10  ;;  %vm411_vm2 = vcmask 1041409   ;;  %vm82_vm3 = vcmp.le.s32.totalorder %v80_v19, 0  ;;  %v110_v24 = vsub.s32 %v107_v11, %v102_v10  ;;  %vm661_vm13 = vmand %vm408_vm0, %vm409_vm1  ;;  %s563_s13 = scalar_lea.vmem %s455_s3, 256  ;;  %p568_p7 = scmp.lt.s32.totalorder %s455_s3, %s455_s3 }
  0x37   :  { %v117_v25 = vsub.s32 %v114_v12, %v102_v10  ;;  %v85_v27 = vadd.f32 %v79_v23, %v76_v22  ;;  %v86_v28 = vsel %vm82_vm3, %v84_v20, %v78_v18  ;;  %v124_v29 = vsub.s32 %v121_v13, %v102_v10  ;;  %p564_p6 = scmp.ne.s32.totalorder %s455_s3, %s563_s13  ;;  %p569_p8 = scmp.lt.s32.totalorder %s563_s13, %s563_s13 }
  0x38   :  { %v183_v30 = vunpack.c.0.s8 %v182_v15  ;;  %vm83_vm4 = vcmp.le.s32.totalorder %v81_v26, 0  ;;  %vm88_vm5 = vcmp.ge.f32.partialorder %v86_v28, %v77_v17  ;;  %vm412_vm6 = vsmask.f32 1024 }
  0x39   :  { %v87_v31 = vsel %vm83_vm4, %v85_v27, %v79_v23  ;;  %vm415_vm7 = vcmask 1042434   ;;  %v90_v32 = vsel %vm88_vm5, 0.0, %v86_v28  ;;  %v602_v33 = vmov 0   ;;  %vm670_vm15 = vmand %vm411_vm2, %vm412_vm6  ;;  %p570_p9 = por %p569_p8, %p568_p7 }
  0x3a   :  { %v96_v34 = vsel %vm88_vm5, 1, %v602_v33  ;;  %vm89_vm8 = vcmp.ge.f32.partialorder %v87_v31, %v77_v17  ;;  %vm416_vm9 = vsmask.f32 2048  ;;  %v92_v35 = vmul.f32 0.9, %v90_v32  ;;  %vm414_vm1 = vmor %vm670_vm15, %vm661_vm13 }
  0x3b   :  { %v104_v36 = vrot.slane %v96_v34, %v103_v21  ;;  %v111_v37 = vrot.slane %v96_v34, %v110_v24  ;;  %v118_v38 = vrot.slane %v96_v34, %v117_v25  ;;  %v125_v39 = vrot.slane %v96_v34, %v124_v29  ;;  %p571_p10 = pnand %p570_p9, %p564_p6 }
  0x3c   :  { %v656_v40 = vsub.s32 %v183_v30, %v102_v10  ;;  %v91_v41 = vsel %vm89_vm8, 0.0, %v87_v31  ;;  %v97_v42 = vsel %vm89_vm8, 1, %v602_v33  ;;  %v94_v43 = vadd.f32 0.05, %v92_v35  ;;  %vm681_vm8 = vmand %vm415_vm7, %vm416_vm9 }
  0x3d   :  { %vm154_vm10 = vcmp.ne.s32.totalorder %v104_v36, 0  ;;  %vm155_vm11 = vcmp.ne.s32.totalorder %v111_v37, 0  ;;  %vm156_vm12 = vcmp.ne.s32.totalorder %v118_v38, 0  ;;  %vm157_vm14 = vcmp.ne.s32.totalorder %v125_v39, 0 }
  0x3e   :  { %v162_v45 = vsel %vm154_vm10, 1, %v602_v33  ;;  %v163_v46 = vsel %vm155_vm11, 1, %v602_v33  ;;  %v164_v47 = vsel %vm156_vm12, 1, %v602_v33  ;;  %v165_v49 = vsel %vm157_vm14, 1, %v602_v33  ;;  %445 = vst [vmem:[#allocation10] sm:$0xff] %v94_v43 }
  0x3f   :  { %v170_v50 = vpack.c.b16 %v163_v46, %v162_v45  ;;  %v93_v51 = vmul.f32 0.9, %v91_v41  ;;  %v132_v52 = vrot.slane %v97_v42, %v103_v21  ;;  %v171_v53 = vpack.c.b16 %v165_v49, %v164_v47 }
  0x40   :  { %v139_v54 = vrot.slane %v97_v42, %v110_v24  ;;  %v146_v55 = vrot.slane %v97_v42, %v117_v25  ;;  %v153_v56 = vrot.slane %v97_v42, %v124_v29  ;;  %vm419_vm2 = vcmask 1043459  }
  0x41   :  { %v95_v57 = vadd.f32 0.05, %v93_v51  ;;  %vm158_vm0 = vcmp.ne.s32.totalorder %v132_v52, 0  ;;  %vm420_vm3 = vsmask.f32 3072  ;;  %v172_v58 = vpack.c.b8 %v171_v53, %v170_v50 }
  0x42   :  { %vm159_vm4 = vcmp.ne.s32.totalorder %v139_v54, 0  ;;  %vm160_vm5 = vcmp.ne.s32.totalorder %v146_v55, 0  ;;  %vm161_vm6 = vcmp.ne.s32.totalorder %v153_v56, 0  ;;  %v166_v60 = vsel %vm158_vm0, 1, %v602_v33 }
  0x43   :  { %v167_v61 = vsel %vm159_vm4, 1, %v602_v33  ;;  %v168_v62 = vsel %vm160_vm5, 1, %v602_v33  ;;  %v169_v63 = vsel %vm161_vm6, 1, %v602_v33  ;;  %446 = vst [vmem:[#allocation10 + $0x8] sm:$0xff] %v95_v57  ;;  %vm176_vm10 = vnez %v172_v58 }
  0x44   :  { %v173_v0 = vpack.c.b16 %v167_v61, %v166_v60  ;;  %v174_v1 = vpack.c.b16 %v169_v63, %v168_v62 }
  0x45   :  { %574 = shalt.err (!%p571_p10)
}
  0x46   :  { %460 = dma.vmem_to_hbm [thread:$0]  %s455_s3, 256, %s823_s5, [#allocation4], %s593_s26, %s593_s26, %s594_s27   ;;  %v178_v2 = vsel %vm176_vm10, 16843009, %v602_v33  ;;  %vm703_vm7 = vmor %vm681_vm8, %vm414_vm1  ;;  %v175_v6 = vpack.c.b8 %v174_v1, %v173_v0  ;;  %vm423_vm11 = vcmask 1044484   ;;  %vm427_vm0 = vcmask 1045509  }
  0x47   :  { %v180_v4 = vcombine.high %v178_v2, %v178_v2  ;;  %v187_v5 = vrot.slane %v178_v2, %v656_v40  ;;  %vm710_vm9 = vmand %vm419_vm2, %vm420_vm3  ;;  %vm424_vm12 = vsmask.f32 4096  ;;  %vm428_vm14 = vsmask.f32 5120  ;;  %v439_v59 = vld [vmem:[%s822_s4] sm:$0xff] }
  0x48   :  { %vm177_vm13 = vnez %v175_v6  ;;  %vm422_vm15 = vmor %vm710_vm9, %vm703_vm7  ;;  %vm432_vm2 = vsmask.f32 6144 }
  0x49   :  { %v194_v8 = vrot.slane %v180_v4, %v656_v40  ;;  %v195_v9 = vcombine.high %v187_v5, %v187_v5  ;;  %v203_v10 = vrot.slane %v187_v5, %v656_v40  ;;  %v179_v11 = vsel %vm177_vm13, 16843009, %v602_v33  ;;  %vm425_vm3 = vmand %vm423_vm11, %vm424_vm12 }
  0x4a   :  { %v229_v13 = vcombine.high %v179_v11, %v179_v11  ;;  %v236_v14 = vrot.slane %v179_v11, %v656_v40  ;;  %vm734_vm11 = vmor %vm425_vm3, %vm422_vm15  ;;  %vm841_vm3 = vsmask.f32 7168 }
  0x4b   :  { %v196_v12 = vcombine.high %v194_v8, %v194_v8  ;;  %v210_v15 = vrot.slane %v194_v8, %v656_v40  ;;  %v217_v16 = vrot.slane %v195_v9, %v656_v40  ;;  %v225_v17 = vcombine.high %v203_v10, %v203_v10  ;;  %vm740_vm5 = vmand %vm427_vm0, %vm428_vm14 }
  0x4c   :  { %vm278_vm4 = vnez %v203_v10  ;;  %v243_v18 = vrot.slane %v229_v13, %v656_v40  ;;  %v244_v19 = vcombine.high %v236_v14, %v236_v14  ;;  %v252_v20 = vrot.slane %v236_v14, %v656_v40  ;;  %vm430_vm9 = vmor %vm740_vm5, %vm734_vm11 }
  0x4d   :  { %v224_v21 = vrot.slane %v196_v12, %v656_v40  ;;  %v226_v22 = vcombine.high %v210_v15, %v210_v15  ;;  %v227_v23 = vcombine.high %v217_v16, %v217_v16  ;;  %vm279_vm8 = vnez %v217_v16 }
  0x4e   :  { %vm280_vm10 = vnez %v225_v17  ;;  %v245_v25 = vcombine.high %v243_v18, %v243_v18  ;;  %vm282_vm12 = vnez %v210_v15  ;;  %v294_v28 = vsel %vm278_vm4, 16843009, %v602_v33  ;;  %v442_v17 = vld [vmem:[%s822_s4 + $0x8] sm:$0xff] }
  0x4f   :  { %v228_v26 = vcombine.high %v224_v21, %v224_v21  ;;  %vm283_vm13 = vnez %v224_v21  ;;  %vm281_vm6 = vnez %v227_v23  ;;  %vm284_vm1 = vnez %v226_v22 }
  0x50   :  { %v295_v29 = vsel %vm279_vm8, 16843009, %v602_v33  ;;  %v296_v30 = vsel %vm280_vm10, 16843009, %v602_v33  ;;  %v297_v31 = vsel %vm281_vm6, 16843009, %v602_v33  ;;  %v259_v42 = vrot.slane %v243_v18, %v656_v40 }
  0x51   :  { %vm285_vm7 = vnez %v228_v26  ;;  %v298_v32 = vsel %vm282_vm12, 16843009, %v602_v33  ;;  %v299_v34 = vsel %vm283_vm13, 16843009, %v602_v33  ;;  %v300_v35 = vsel %vm284_vm1, 16843009, %v602_v33 }
  0x52   :  { %v301_v36 = vsel %vm285_vm7, 16843009, %v602_v33  ;;  %v310_v37 = vcombine.low %v294_v28, %v295_v29  ;;  %v311_v38 = vcombine.low %v296_v30, %v297_v31  ;;  %v312_v39 = vcombine.low %v298_v32, %v299_v34 }
  0x53   :  { %v313_v41 = vcombine.low %v300_v35, %v301_v36  ;;  %vm838_vm14 = vcmask 1046534   ;;  %v266_v44 = vrot.slane %v244_v19, %v656_v40  ;;  %v273_v45 = vrot.slane %v245_v25, %v656_v40 }
  0x54   :  { %vm433_vm15 = vmand %vm838_vm14, %vm432_vm2  ;;  %v320_v43 = vrot.slane %v310_v37, %v656_v40  ;;  %v274_v46 = vcombine.high %v252_v20, %v252_v20  ;;  %v327_v47 = vrot.slane %v311_v38, %v656_v40  ;;  %v334_v48 = vrot.slane %v312_v39, %v656_v40 }
  0x55   :  { %v341_v49 = vrot.slane %v313_v41, %v656_v40  ;;  %v275_v50 = vcombine.high %v259_v42, %v259_v42  ;;  %vm766_vm0 = vmor %vm433_vm15, %vm430_vm9  ;;  %v276_v52 = vcombine.high %v266_v44, %v266_v44  ;;  %v277_v53 = vcombine.high %v273_v45, %v273_v45 }
  0x56   :  { %vm286_vm1 = vnez %v252_v20  ;;  %vm287_vm2 = vnez %v266_v44  ;;  %v342_v54 = vcombine.low %v320_v43, %v327_v47  ;;  %vm842_vm4 = vcmask 1047559  }
  0x57   :  { %v343_v55 = vcombine.low %v334_v48, %v341_v49  ;;  %vm772_vm5 = vmand %vm842_vm4, %vm841_vm3  ;;  %vm288_vm6 = vnez %v274_v46  ;;  %vm290_vm8 = vnez %v259_v42  ;;  %vm289_vm10 = vnez %v276_v52 }
  0x58   :  { %vm291_vm11 = vnez %v273_v45  ;;  %vm292_vm12 = vnez %v275_v50  ;;  %vm293_vm13 = vnez %v277_v53  ;;  %v350_v57 = vrot.slane %v342_v54, %v656_v40  ;;  %vm438_vm7 = vmor %vm772_vm5, %vm766_vm0 }
  0x59   :  { %v357_v58 = vrot.slane %v343_v55, %v656_v40  ;;  %v302_v60 = vsel %vm286_vm1, 16843009, %v602_v33  ;;  %v303_v61 = vsel %vm287_vm2, 16843009, %v602_v33  ;;  %v304_v62 = vsel %vm288_vm6, 16843009, %v602_v33 }
  0x5a   :  { %v305_v63 = vsel %vm289_vm10, 16843009, %v602_v33  ;;  %v306_v0 = vsel %vm290_vm8, 16843009, %v602_v33  ;;  %v359_v1 = vcombine.low %v302_v60, %v303_v61  ;;  %v307_v3 = vsel %vm291_vm11, 16843009, %v602_v33 }
  0x5b   :  { %v358_v2 = vcombine.low %v350_v57, %v357_v58  ;;  %v308_v4 = vsel %vm292_vm12, 16843009, %v602_v33  ;;  %v309_v5 = vsel %vm293_vm13, 16843009, %v602_v33  ;;  %v360_v6 = vcombine.low %v304_v62, %v305_v63 }
  0x5c   :  { %v361_v7 = vcombine.low %v306_v0, %v307_v3  ;;  %v362_v8 = vcombine.low %v308_v4, %v309_v5  ;;  %v369_v9 = vrot.slane %v359_v1, %v656_v40 }
  0x5d   :  { %v440_v10 = vsel %vm438_vm7, %v358_v2, %v439_v59  ;;  %v376_v11 = vrot.slane %v360_v6, %v656_v40 }
  0x5e   :  { %441 = vst [vmem:[%s822_s4] sm:$0xff] %v440_v10  ;;  %v383_v12 = vrot.slane %v361_v7, %v656_v40  ;;  %v390_v33 = vrot.slane %v362_v8, %v656_v40 }
  0x5f   :  { %v391_v13 = vcombine.low %v369_v9, %v376_v11 }
  0x60   :  { %v392_v14 = vcombine.low %v383_v12, %v390_v33 }
  0x61   :  { %v399_v15 = vrot.slane %v391_v13, %v656_v40 }
  0x62   :  { %v406_v16 = vrot.slane %v392_v14, %v656_v40 }
  0x64   :  { %v407_v18 = vcombine.low %v399_v15, %v406_v16 }
  0x66   :  { %v443_v19 = vsel %vm438_vm7, %v407_v18, %v442_v17 }
  0x67   :  { %444 = vst [vmem:[%s822_s4 + $0x8] sm:$0xff] %v443_v19 }
  0x68   :  { %589 = dma.done.wait [#allocation4], 256  }
  0x69   :  { %590 = vsyncadd [#allocation4], 4294967040 }
  0x6a   :  { %466 = vsyncpa [#allocation3], 1 }
  0x6b   :  { %467 = vsyncpa [#allocation6], 1 }
  0x6c   :  { %468 = vsyncpa [#allocation9], 1 }
  0x6d   :  { %469 = vsyncpa [#allocation4], 1 }

</bundles_post_ra>
